<compile_context>
chip_gen: v7x
topology: tpu7x:2x2x1
jax: 0.10.0
libtpu: 0.0.40
codegen_flags: <defaults>
</compile_context>

<pallas_src>
import jax
import jax.numpy as jnp
from jax import lax
from jax.experimental import pallas as pl
from jax.experimental.pallas import tpu as pltpu

H1, H2, H3 = 512, 128, 1


def mlp_kernel(x_ref, w1_ref, b1_ref, w2_ref, b2_ref, w3_ref, b3_ref, o_ref):
    # In-kernel cast to bf16 for the MXU (x arrives as f32 from HBM; the cast
    # is VPU work overlapped with MXU compute). Accumulation stays f32.
    x_bf = x_ref[...].astype(jnp.bfloat16)                                      # (tb, F)

    # fc1: bf16 MXU matmul, f32 accumulation; bias + relu in f32 on the VPU.
    h1 = jnp.dot(x_bf, w1_ref[...], preferred_element_type=jnp.float32)        # (tb, 512)
    h1 = jnp.maximum(h1 + b1_ref[...], 0.0)
    # TODO(synk): nn.Dropout(0.2) is identity at inference time; training-mode
    # stochastic masking (pltpu.prng_*) is intentionally not emitted here.

    # fc2: cast activation back to bf16 for the MXU, accumulate in f32.
    h2 = jnp.dot(h1.astype(jnp.bfloat16), w2_ref[...],
                 preferred_element_type=jnp.float32)                            # (tb, 128)
    h2 = jnp.maximum(h2 + b2_ref[...], 0.0)

    # fc3 (output width 1): contract w3_row (1,128) against h2 (tb,128) on the
    # 128-dim so the result lands directly as a lane-dense (1, tb) slab.
    logits = lax.dot_general(w3_ref[...], h2,
                             dimension_numbers=(((1,), (1,)), ((), ())),
                             preferred_element_type=jnp.float32)                # (1, tb)
    logits = logits + b3_ref[...]

    # Sigmoid on the EUP over a lane-dense vector; unmasked full-width store.
    o_ref[...] = jax.nn.sigmoid(logits).astype(o_ref.dtype)


def _choose_tb(batch, tb_max):
    """Pick a batch tile: full-batch single tile for small B, otherwise the
    largest multiple-of-8 tile <= tb_max that divides B (no padding). Returns
    tb_max (pad fallback) only if no such divisor exists."""
    if batch <= tb_max:
        return batch                      # single tile == full array dims; no pad
    for t in range(tb_max, 7, -8):
        if batch % t == 0:
            return t
    return tb_max                         # fallback: wrapper pads (extra HBM pass)


def mlp_forward(x, params, *, tb=512):
    """x: (B, 1, F) float32. Returns (B, 1) float32 (same as the torch module).

    tb: max batch tile (rows per MXU pass). 512 default; sweep 512-2048 for
    large production batches, respecting the per-generation VMEM / 2-TC notes
    at the top of this file. Prefer production B that is a multiple of tb so
    no padding pass over x is needed.
    """
    w1, b1, w2, b2, w3, b3 = params
    x2d = jnp.squeeze(x, axis=1)                                    # (B, F) f32
    B, F = x2d.shape

    tb_eff = _choose_tb(B, tb)
    B_pad = pl.cdiv(B, tb_eff) * tb_eff
    if B_pad != B:
        # Fallback only (non-divisible batch): costs one extra HBM pass over x.
        x2d = jnp.pad(x2d, ((0, B_pad - B), (0, 0)))

    # Weights are tiny: cast once in the wrapper. Biases + fc3 weight stay f32
    # so all elementwise work stays on the f32 VPU/EUP path (v5e-safe).
    w1_bf = w1.astype(jnp.bfloat16)
    w2_bf = w2.astype(jnp.bfloat16)
    w3_row = w3.reshape(1, H2)                                      # (1, 128) f32

    grid = (B_pad // tb_eff,)
    out = pl.pallas_call(
        mlp_kernel,
        out_shape=jax.ShapeDtypeStruct((1, B_pad), jnp.float32),
        grid_spec=pltpu.PrefetchScalarGridSpec(
            num_scalar_prefetch=0,
            grid=grid,
            in_specs=[
                pl.BlockSpec((tb_eff, F), lambda i: (i, 0)),   # x tile over batch (f32)
                # Weights/biases: constant (0,0) index maps -> stay resident in
                # VMEM across grid steps (no re-DMA per step).
                pl.BlockSpec((F, H1), lambda i: (0, 0)),       # W1 (bf16)
                pl.BlockSpec((1, H1), lambda i: (0, 0)),       # b1 (f32)
                pl.BlockSpec((H1, H2), lambda i: (0, 0)),      # W2 (bf16)
                pl.BlockSpec((1, H2), lambda i: (0, 0)),       # b2 (f32)
                pl.BlockSpec((1, H2), lambda i: (0, 0)),       # w3 row (f32)
                pl.BlockSpec((1, H3), lambda i: (0, 0)),       # b3 (f32)
            ],
            # Lane-dense output slab: last dim = tb_eff.
            out_specs=pl.BlockSpec((1, tb_eff), lambda i: (0, i)),
        ),
        compiler_params=pltpu.CompilerParams(
            dimension_semantics=("parallel",)),
    )(x2d, w1_bf, b1, w2_bf, b2, w3_row, b3)

    # Free layout plumbing: slice off batch padding, back to (B, 1).
    return out[0, :B].reshape(B, 1)


def init_params(num_features, key):
    """Deterministic init mirroring nn.Linear's U(-1/sqrt(fan_in), 1/sqrt(fan_in))."""
    ks = jax.random.split(key, 6)

    def linear(kw, kb, fan_in, fan_out):
        bound = 1.0 / jnp.sqrt(fan_in)
        w = jax.random.uniform(kw, (fan_in, fan_out), jnp.float32, -bound, bound)
        b = jax.random.uniform(kb, (1, fan_out), jnp.float32, -bound, bound)
        return w, b

    w1, b1 = linear(ks[0], ks[1], num_features, H1)
    w2, b2 = linear(ks[2], ks[3], H1, H2)
    w3, b3 = linear(ks[4], ks[5], H2, H3)
    return (w1, b1, w2, b2, w3, b3)


def mlp_reference_f32(x, params):
    """Pure-f32 JAX reference of the torch forward (dropout = eval identity)."""
    w1, b1, w2, b2, w3, b3 = params
    h = jnp.squeeze(x, axis=1)
    h = jnp.maximum(h @ w1 + b1, 0.0)
    h = jnp.maximum(h @ w2 + b2, 0.0)
    return jax.nn.sigmoid(h @ w3 + b3)


def mlp_reference_bf16(x, params):
    """Reference with the same bf16-MXU / f32-accumulation recipe as the kernel."""
    w1, b1, w2, b2, w3, b3 = params
    h = jnp.squeeze(x, axis=1).astype(jnp.bfloat16)
    h = jnp.dot(h, w1.astype(jnp.bfloat16), preferred_element_type=jnp.float32)
    h = jnp.maximum(h + b1, 0.0)
    h = jnp.dot(h.astype(jnp.bfloat16), w2.astype(jnp.bfloat16),
                preferred_element_type=jnp.float32)
    h = jnp.maximum(h + b2, 0.0)
    return jax.nn.sigmoid(h @ w3 + b3)


if __name__ == "__main__":
    key = jax.random.PRNGKey(0)
    k_x, k_p = jax.random.split(key)

    batch, num_features = 16, 32
    x = jax.random.normal(k_x, (batch, 1, num_features), jnp.float32)
    params = init_params(num_features, k_p)

    out = jax.block_until_ready(mlp_forward(x, params))
    assert out.shape == (batch, 1)

    # Loose check vs. pure-f32 math (covers the bf16 MXU rounding) ...
    ref32 = mlp_reference_f32(x, params)
    assert jnp.allclose(out, ref32, atol=2e-2, rtol=2e-2), "mismatch vs f32 reference"
    # ... and a tighter check vs. the same bf16/f32-acc recipe.
    refbf = mlp_reference_bf16(x, params)
    assert jnp.allclose(out, refbf, atol=1e-3, rtol=1e-3), "mismatch vs bf16 reference"

    print("KERNEL_OK")
</pallas_src>

<mosaic_0001>
module attributes {stable_mosaic.version = 11 : i64} {
  func.func @mlp_kernel(%arg0: i32, %arg1: memref<16x32xf32, #tpu.memory_space<vmem>>, %arg2: memref<32x512xbf16, #tpu.memory_space<vmem>>, %arg3: memref<1x512xf32, #tpu.memory_space<vmem>>, %arg4: memref<512x128xbf16, #tpu.memory_space<vmem>>, %arg5: memref<1x128xf32, #tpu.memory_space<vmem>>, %arg6: memref<1x128xf32, #tpu.memory_space<vmem>>, %arg7: memref<1x1xf32, #tpu.memory_space<vmem>>, %arg8: memref<1x16xf32, #tpu.memory_space<vmem>>) attributes {dimension_semantics = [#tpu.dimension_semantics<parallel>], iteration_bounds = array<i64: 1>, scalar_prefetch = 0 : i64, scratch_operands = 0 : i64, tpu.core_type = #tpu.core_type<tc>, window_params = [{transform_indices = @transform_0, window_bounds = array<i64: 16, 32>}, {pipeline_mode = #tpu.pipeline_mode<synchronous>, transform_indices = @transform_1, window_bounds = array<i64: 32, 512>}, {pipeline_mode = #tpu.pipeline_mode<synchronous>, transform_indices = @transform_2, window_bounds = array<i64: 1, 512>}, {pipeline_mode = #tpu.pipeline_mode<synchronous>, transform_indices = @transform_3, window_bounds = array<i64: 512, 128>}, {pipeline_mode = #tpu.pipeline_mode<synchronous>, transform_indices = @transform_4, window_bounds = array<i64: 1, 128>}, {pipeline_mode = #tpu.pipeline_mode<synchronous>, transform_indices = @transform_5, window_bounds = array<i64: 1, 128>}, {pipeline_mode = #tpu.pipeline_mode<synchronous>, transform_indices = @transform_6, window_bounds = array<i64: 1, 1>}, {transform_indices = @transform_7, window_bounds = array<i64: 1, 16>}]} {
    %c0 = arith.constant 0 : index
    %c0_0 = arith.constant 0 : index
    %0 = vector.load %arg1[%c0, %c0_0] : memref<16x32xf32, #tpu.memory_space<vmem>>, vector<16x32xf32>
    %1 = arith.truncf %0 : vector<16x32xf32> to vector<16x32xbf16>
    %c0_1 = arith.constant 0 : index
    %c0_2 = arith.constant 0 : index
    %2 = vector.load %arg2[%c0_1, %c0_2] : memref<32x512xbf16, #tpu.memory_space<vmem>>, vector<32x512xbf16>
    %cst = arith.constant dense<0.000000e+00> : vector<16x512xf32>
    %3 = tpu.matmul %1, %2, %cst {dimension_numbers = #tpu.dot_dimension_numbers<[1], [0], [0], [1], [0, 0, 1, 1], [], []>} : vector<16x32xbf16>, vector<32x512xbf16>, vector<16x512xf32> -> vector<16x512xf32>
    %c0_3 = arith.constant 0 : index
    %c0_4 = arith.constant 0 : index
    %4 = vector.load %arg3[%c0_3, %c0_4] : memref<1x512xf32, #tpu.memory_space<vmem>>, vector<1x512xf32>
    %5 = vector.broadcast %4 : vector<1x512xf32> to vector<16x512xf32>
    %6 = arith.addf %3, %5 : vector<16x512xf32>
    %cst_5 = arith.constant 0.000000e+00 : f32
    %7 = vector.broadcast %cst_5 : f32 to vector<16x512xf32>
    %8 = arith.maximumf %6, %7 : vector<16x512xf32>
    %9 = arith.truncf %8 : vector<16x512xf32> to vector<16x512xbf16>
    %c0_6 = arith.constant 0 : index
    %c0_7 = arith.constant 0 : index
    %10 = vector.load %arg4[%c0_6, %c0_7] : memref<512x128xbf16, #tpu.memory_space<vmem>>, vector<512x128xbf16>
    %cst_8 = arith.constant dense<0.000000e+00> : vector<16x128xf32>
    %11 = tpu.matmul %9, %10, %cst_8 {dimension_numbers = #tpu.dot_dimension_numbers<[1], [0], [0], [1], [0, 0, 1, 1], [], []>} : vector<16x512xbf16>, vector<512x128xbf16>, vector<16x128xf32> -> vector<16x128xf32>
    %c0_9 = arith.constant 0 : index
    %c0_10 = arith.constant 0 : index
    %12 = vector.load %arg5[%c0_9, %c0_10] : memref<1x128xf32, #tpu.memory_space<vmem>>, vector<1x128xf32>
    %13 = vector.broadcast %12 : vector<1x128xf32> to vector<16x128xf32>
    %14 = arith.addf %11, %13 : vector<16x128xf32>
    %cst_11 = arith.constant 0.000000e+00 : f32
    %15 = vector.broadcast %cst_11 : f32 to vector<16x128xf32>
    %16 = arith.maximumf %14, %15 : vector<16x128xf32>
    %c0_12 = arith.constant 0 : index
    %c0_13 = arith.constant 0 : index
    %17 = vector.load %arg6[%c0_12, %c0_13] : memref<1x128xf32, #tpu.memory_space<vmem>>, vector<1x128xf32>
    %cst_14 = arith.constant dense<0.000000e+00> : vector<1x16xf32>
    %18 = tpu.matmul %17, %16, %cst_14 {dimension_numbers = #tpu.dot_dimension_numbers<[1], [1], [0], [0], [0, 0, 1, 0], [], []>} : vector<1x128xf32>, vector<16x128xf32>, vector<1x16xf32> -> vector<1x16xf32>
    %c0_15 = arith.constant 0 : index
    %c0_16 = arith.constant 0 : index
    %19 = vector.load %arg7[%c0_15, %c0_16] : memref<1x1xf32, #tpu.memory_space<vmem>>, vector<1x1xf32>
    %20 = vector.broadcast %19 : vector<1x1xf32> to vector<1x16xf32>
    %21 = arith.addf %18, %20 : vector<1x16xf32>
    %22 = arith.negf %21 : vector<1x16xf32>
    %23 = math.exp %22 : vector<1x16xf32>
    %cst_17 = arith.constant 1.000000e+00 : f32
    %24 = vector.broadcast %cst_17 : f32 to vector<1x16xf32>
    %25 = arith.addf %24, %23 : vector<1x16xf32>
    %26 = arith.divf %24, %25 : vector<1x16xf32>
    %c0_18 = arith.constant 0 : index
    %c0_19 = arith.constant 0 : index
    %27 = vector.load %arg8[%c0_18, %c0_19] : memref<1x16xf32, #tpu.memory_space<vmem>>, vector<1x16xf32>
    tpu.vector_store %arg8[%c0_18, %c0_19], %26 {strides = array<i32>} : memref<1x16xf32, #tpu.memory_space<vmem>>, vector<1x16xf32>,
    return
  }
  func.func @transform_0(%arg0: i32) -> (i32, i32) {
    %c0_i32 = arith.constant 0 : i32
    %c0_i32_0 = arith.constant 0 : i32
    return %arg0, %c0_i32 : i32, i32
  }
  func.func @transform_1(%arg0: i32) -> (i32, i32) {
    %c0_i32 = arith.constant 0 : i32
    %c0_i32_0 = arith.constant 0 : i32
    %c0_i32_1 = arith.constant 0 : i32
    return %c0_i32, %c0_i32_0 : i32, i32
  }
  func.func @transform_2(%arg0: i32) -> (i32, i32) {
    %c0_i32 = arith.constant 0 : i32
    %c0_i32_0 = arith.constant 0 : i32
    %c0_i32_1 = arith.constant 0 : i32
    return %c0_i32, %c0_i32_0 : i32, i32
  }
  func.func @transform_3(%arg0: i32) -> (i32, i32) {
    %c0_i32 = arith.constant 0 : i32
    %c0_i32_0 = arith.constant 0 : i32
    %c0_i32_1 = arith.constant 0 : i32
    return %c0_i32, %c0_i32_0 : i32, i32
  }
  func.func @transform_4(%arg0: i32) -> (i32, i32) {
    %c0_i32 = arith.constant 0 : i32
    %c0_i32_0 = arith.constant 0 : i32
    %c0_i32_1 = arith.constant 0 : i32
    return %c0_i32, %c0_i32_0 : i32, i32
  }
  func.func @transform_5(%arg0: i32) -> (i32, i32) {
    %c0_i32 = arith.constant 0 : i32
    %c0_i32_0 = arith.constant 0 : i32
    %c0_i32_1 = arith.constant 0 : i32
    return %c0_i32, %c0_i32_0 : i32, i32
  }
  func.func @transform_6(%arg0: i32) -> (i32, i32) {
    %c0_i32 = arith.constant 0 : i32
    %c0_i32_0 = arith.constant 0 : i32
    %c0_i32_1 = arith.constant 0 : i32
    return %c0_i32, %c0_i32_0 : i32, i32
  }
  func.func @transform_7(%arg0: i32) -> (i32, i32) {
    %c0_i32 = arith.constant 0 : i32
    %c0_i32_0 = arith.constant 0 : i32
    return %c0_i32, %arg0 : i32, i32
  }
}

</mosaic_0001>

<bundles_post_ra>
// kernel: tpu_custom_call.1
= control target key start
LH: loop header
LB: loop body
LE: loop exit
PB: predicated region body
PF: predicated region fallthrough
CT: control target
= control target key end

     0   :  { %s1080_s0 = inlined_call_operand.hbm [shape: f32[16,32], index: 0, kind: input, shape index: {}]   ;;  %s1081_s1 = inlined_call_operand.hbm [shape: bf16[32,512], index: 1, kind: input, shape index: {}]   ;;  %s1082_s2 = inlined_call_operand.vmem [shape: f32[1,512], index: 2, kind: input, shape index: {}]   ;;  %s1083_s3 = inlined_call_operand.hbm [shape: bf16[512,128], index: 3, kind: input, shape index: {}]   ;;  %s1084_s4 = inlined_call_operand.vmem [shape: f32[1,128], index: 4, kind: input, shape index: {}]   ;;  %s1085_s5 = inlined_call_operand.vmem [shape: f32[1,128], index: 5, kind: input, shape index: {}]   ;;  %s1086_s6 = inlined_call_operand.<no memory space> [shape: f32[1,1], index: 6, kind: input, shape index: {}]   ;;  %s1087_s7 = inlined_call_operand.hbm [shape: f32[1,16], index: 7, kind: output, shape index: {}]  }
   0x1   :  { %v12_v0 = vstv %s1086_s6 }
   0x2   :  { %13 = vst [vmem:[#allocation2] sm:$0x1] %v12_v0 }
   0x3   :  { %14 = vsyncpa [#allocation4], 0 }
   0x4   :  { %15 = vsyncpa [#allocation7], 0 }
   0x5   :  { %16 = vsyncpa [#allocation5], 0  ;;  %s956_s26 = smov [#allocation6]   ;;  %s862_s30 = scalar_lea.hbm %s1081_s1, 1024 }
   0x6   :  { %s34_s27 = sshll.u32 %s956_s26, 4  ;;  %p863_p0 = scmp.ne.s32.totalorder %s1081_s1, %s862_s30  ;;  %s35_s27 = int_to_ptr.vmem [resolvable:$true] %s34_s27 }
   0x7   :  { %p866_p1 = scmp.lt.u32.totalorder %s862_s30, %s1081_s1 }
   0x9   :  { %p868_p2 = pnand %p866_p1, %p863_p0 }
   0xb   :  { %871 = shalt.err (!%p868_p2)
}
   0xc   :  { %s872_s6 = scalar_lea.vmem %s35_s27, 1024  ;;  %p877_p4 = scmp.lt.s32.totalorder %s35_s27, %s35_s27 }
   0xd   :  { %p873_p3 = scmp.ne.s32.totalorder %s35_s27, %s872_s6  ;;  %p878_p5 = scmp.lt.s32.totalorder %s872_s6, %s872_s6 }
   0xf   :  { %p879_p6 = por %p878_p5, %p877_p4 }
  0x11   :  { %p880_p7 = pnand %p879_p6, %p873_p3 }
  0x13   :  { %883 = shalt.err (!%p880_p7)
}
  0x14   :  { %s957_s12 = smov 256   ;;  %s958_s13 = smov 16  }
  0x15   :  { %40 = dma.hbm_to_vmem [thread:$0]  %s1081_s1, 1024, %s35_s27, [#allocation7], %s957_s12, %s957_s12, %s958_s13  }
  0x16   :  { %s959_s16 = smov [#allocation3]   ;;  %s884_s20 = scalar_lea.hbm %s1080_s0, 256 }
  0x17   :  { %s22_s17 = sshll.u32 %s959_s16, 4  ;;  %p885_p8 = scmp.ne.s32.totalorder %s1080_s0, %s884_s20  ;;  %s23_s17 = int_to_ptr.vmem [resolvable:$true] %s22_s17 }
  0x18   :  { %p888_p9 = scmp.lt.u32.totalorder %s884_s20, %s1080_s0 }
  0x1a   :  { %p890_p10 = pnand %p888_p9, %p885_p8 }
  0x1c   :  { %893 = shalt.err (!%p890_p10)
}
  0x1d   :  { %s894_s25 = scalar_lea.vmem %s23_s17, 256  ;;  %p899_p12 = scmp.lt.s32.totalorder %s23_s17, %s23_s17 }
  0x1e   :  { %p895_p11 = scmp.ne.s32.totalorder %s23_s17, %s894_s25  ;;  %p900_p13 = scmp.lt.s32.totalorder %s894_s25, %s894_s25 }
  0x20   :  { %p901_p0 = por %p900_p13, %p899_p12 }
  0x22   :  { %p902_p1 = pnand %p901_p0, %p895_p11 }
  0x24   :  { %905 = shalt.err (!%p902_p1)
}
  0x25   :  { %s960_s1 = smov 128   ;;  %s961_s26 = smov 8  }
  0x26   :  { %28 = dma.hbm_to_vmem [thread:$0]  %s1080_s0, 256, %s23_s17, [#allocation4], %s960_s1, %s960_s1, %s961_s26  }
  0x27   :  { %s962_s29 = smov [#allocation8]   ;;  %s906_s10 = scalar_lea.hbm %s1083_s3, 4096 }
  0x28   :  { %s48_s30 = sshll.u32 %s962_s29, 4  ;;  %p907_p2 = scmp.ne.s32.totalorder %s1083_s3, %s906_s10  ;;  %s49_s30 = int_to_ptr.vmem [resolvable:$true] %s48_s30 }
  0x29   :  { %p910_p3 = scmp.lt.u32.totalorder %s906_s10, %s1083_s3 }
  0x2b   :  { %p912_p4 = pnand %p910_p3, %p907_p2 }
  0x2d   :  { %915 = shalt.err (!%p912_p4)
}
  0x2e   :  { %s916_s14 = scalar_lea.vmem %s49_s30, 4096  ;;  %p921_p6 = scmp.lt.s32.totalorder %s49_s30, %s49_s30 }
  0x2f   :  { %p917_p5 = scmp.ne.s32.totalorder %s49_s30, %s916_s14  ;;  %p922_p7 = scmp.lt.s32.totalorder %s916_s14, %s916_s14 }
  0x31   :  { %p923_p8 = por %p922_p7, %p921_p6 }
  0x33   :  { %p924_p9 = pnand %p923_p8, %p917_p5 }
  0x35   :  { %927 = shalt.err (!%p924_p9)
}
  0x36   :  { %s963_s0 = smov 64   ;;  %s964_s15 = smov 4  }
  0x37   :  { %54 = dma.hbm_to_vmem [thread:$0]  %s1083_s3, 4096, %s49_s30, [#allocation7], %s963_s0, %s963_s0, %s964_s15  }
  0x38   :  { %950 = dma.done.wait [#allocation4], 256  }
  0x39   :  { %951 = vsyncadd [#allocation4], 4294967040 }
  0x3a   :  { %952 = dma.done.wait [#allocation7], 5120  }
  0x3b   :  { %953 = vsyncadd [#allocation7], 4294962176  ;;  %v965_v1 = vmov 0   ;;  %v814_v2 = vld [vmem:[#allocation6 + $0x4] ss:$16 sps:$4 sm:$0xff]   ;;  %v72_v11 = vld [vmem:[#allocation3 + $0x8] sm:$0xff]  ;;  %v84_v45 = vlaneseq }
  0x3c   :  { %180 = vmatprep.mubr.bf16.mxu0 %v965_v1  ;;  %223 = vmatprep.mubr.bf16.mxu1 %v965_v1  ;;  %v816_v3 = vld [vmem:[#allocation6 + $0xc] ss:$16 sps:$4 sm:$0xff]   ;;  %v818_v4 = vld [vmem:[#allocation6] ss:$16 sps:$4 sm:$0xff]   ;;  %v819_v5 = vld [vmem:[#allocation6 + $0x8] ss:$16 sps:$4 sm:$0xff]  }
  0x3d   :  { %813 = vset.pattern.permute.xlu0 %v965_v1  ;;  %148 = vmatprep.subr.bf16.mxu0 %v814_v2  ;;  %v820_v6 = vld [vmem:[#allocation6 + $0x24] ss:$16 sps:$4 sm:$0xff]   ;;  %v822_v7 = vld [vmem:[#allocation6 + $0x2c] ss:$16 sps:$4 sm:$0xff]   ;;  %v824_v8 = vld [vmem:[#allocation6 + $0x20] ss:$16 sps:$4 sm:$0xff]  }
  0x3e   :  { %191 = vmatprep.subr.bf16.mxu1 %v816_v3  ;;  %149 = vmatpush1.bf16.msra.mxu0 %v818_v4  ;;  %v825_v9 = vld [vmem:[#allocation6 + $0x28] ss:$16 sps:$4 sm:$0xff]   ;;  %v71_v10 = vld [vmem:[#allocation3] sm:$0xff]  ;;  %v826_v12 = vld [vmem:[#allocation8 + $0x40] sm:$0xff]   ;;  %vm144_vm0 = vcmask 261120   ;;  %v1049_v46 = vshrl.u32 %v84_v45, 7 }
  0x3f   :  { %192 = vmatpush1.bf16.msra.mxu1 %v819_v5  ;;  %150 = vmatprep.subr.bf16.mxu0 %v820_v6  ;;  %v73_v13 = vpack.c.bf16 %v72_v11, %v71_v10  ;;  %v827_v14 = vld [vmem:[#allocation8 + $0xc0] sm:$0xff]   ;;  %v830_v17 = vld [vmem:[#allocation8 + $0x48] sm:$0xff]   ;;  %v834_v21 = vld [vmem:[#allocation8 + $0x50] sm:$0xff]   ;;  %vm967_vm1 = vmmov 0   ;;  %s969_s21 = smov [#allocation9]   ;;  %vm680_vm2 = vcmask 122880  }
  0x40   :  { %193 = vmatprep.subr.bf16.mxu1 %v822_v7  ;;  %v828_v15 = vld [vmem:[#allocation8] sm:$0xff]   ;;  %v831_v18 = vld [vmem:[#allocation8 + $0xc8] sm:$0xff]   ;;  %v835_v22 = vld [vmem:[#allocation8 + $0xd0] sm:$0xff]   ;;  %v86_v47 = vsub.s32 0, %v1049_v46  ;;  %v94_v48 = vsub.s32 2, %v1049_v46  ;;  %v90_v50 = vsub.s32 1, %v1049_v46 }
  0x41   :  { %v829_v16 = vld [vmem:[#allocation8 + $0x80] sm:$0xff]   ;;  %v832_v19 = vld [vmem:[#allocation8 + $0x8] sm:$0xff]   ;;  %v836_v23 = vld [vmem:[#allocation8 + $0x10] sm:$0xff]   ;;  %v98_v51 = vsub.s32 3, %v1049_v46  ;;  %s688_s22 = sshll.u32 %s969_s21, 4  ;;  %s689_s22 = int_to_ptr.vmem [resolvable:$true] %s688_s22 }
  0x42   :  { %151 = vmatpush1.bf16.msra.mxu0 %v824_v8  ;;  %v833_v20 = vld [vmem:[#allocation8 + $0x88] sm:$0xff]   ;;  %v837_v24 = vld [vmem:[#allocation8 + $0x90] sm:$0xff]   ;;  %v838_v25 = vld [vmem:[#allocation8 + $0x58] sm:$0xff]   ;;  %s932_s23 = scalar_lea.vmem %s689_s22, 32  ;;  %p933_p11 = scmp.lt.s32.totalorder %s689_s22, %s689_s22 }
  0x43   :  { %194 = vmatpush1.bf16.msra.mxu1 %v825_v9  ;;  %742 = vmatprep.subr.bf16.mxu0 %v826_v12  ;;  %v839_v26 = vld [vmem:[#allocation8 + $0xd8] sm:$0xff]   ;;  %v842_v29 = vld [vmem:[#allocation8 + $0x60] sm:$0xff]   ;;  %v846_v33 = vld [vmem:[#allocation8 + $0x68] sm:$0xff]  }
  0x44   :  { %764 = vmatprep.subr.bf16.mxu1 %v827_v14  ;;  %v840_v27 = vld [vmem:[#allocation8 + $0x18] sm:$0xff]   ;;  %v843_v30 = vld [vmem:[#allocation8 + $0xe0] sm:$0xff]   ;;  %v847_v34 = vld [vmem:[#allocation8 + $0xe8] sm:$0xff]  }
  0x45   :  { %706 = vmatmul.mubr.msk.bf16.vlgmr.msra.gmra.mrb[0].mxu0 %vm144_vm0, %v73_v13  ;;  %v841_v28 = vld [vmem:[#allocation8 + $0x98] sm:$0xff]   ;;  %v844_v31 = vld [vmem:[#allocation8 + $0x20] sm:$0xff]   ;;  %v848_v35 = vld [vmem:[#allocation8 + $0x28] sm:$0xff]  }
  0x46   :  { %707 = vmatmul.mubr.msk.bf16.vlgmr.msra.gmra.mrb[0].mxu1 %vm144_vm0, %v73_v13  ;;  %743 = vmatpush3.bf16.msra.mxu0 %v828_v15  ;;  %v845_v32 = vld [vmem:[#allocation8 + $0xa0] sm:$0xff]   ;;  %v849_v36 = vld [vmem:[#allocation8 + $0xa8] sm:$0xff]   ;;  %v850_v37 = vld [vmem:[#allocation8 + $0x70] sm:$0xff]  }
  0x47   :  { %765 = vmatpush3.bf16.msra.mxu1 %v829_v16  ;;  %744 = vmatprep.subr.bf16.mxu0 %v830_v17  ;;  %v851_v38 = vld [vmem:[#allocation8 + $0xf0] sm:$0xff]   ;;  %v854_v41 = vld [vmem:[#allocation8 + $0x78] sm:$0xff]  }
  0x48   :  { %766 = vmatprep.subr.bf16.mxu1 %v831_v18  ;;  %v852_v39 = vld [vmem:[#allocation8 + $0x30] sm:$0xff]   ;;  %v855_v42 = vld [vmem:[#allocation8 + $0xf8] sm:$0xff]  }
  0x49   :  { %v853_v40 = vld [vmem:[#allocation8 + $0xb0] sm:$0xff]   ;;  %v856_v43 = vld [vmem:[#allocation8 + $0x38] sm:$0xff]  }
  0x4a   :  { %745 = vmatpush3.bf16.msra.mxu0 %v832_v19  ;;  %v857_v44 = vld [vmem:[#allocation8 + $0xb8] sm:$0xff]   ;;  %v82_v49 = vld [vmem:[%s1082_s2] sm:$0xf] }
  0x4b   :  { %767 = vmatpush3.bf16.msra.mxu1 %v833_v20  ;;  %746 = vmatprep.subr.bf16.mxu0 %v834_v21  ;;  %v87_v52 = vrot.slane %v82_v49, %v86_v47  ;;  %v95_v53 = vrot.slane %v82_v49, %v94_v48  ;;  %v91_v54 = vrot.slane %v82_v49, %v90_v50  ;;  %v966_v20 = vmov 0.0|0.0  }
  0x4c   :  { %768 = vmatprep.subr.bf16.mxu1 %v835_v22  ;;  %v99_v55 = vrot.slane %v82_v49, %v98_v51  ;;  %v968_v21 = vmov 0.0   ;;  %v594_v22 = vld [vmem:[#allocation2] sm:$0x1] }
  0x4d   :  { %597 = vperm.xlu0 %813, %v594_v22  }
  0x4e   :  { %747 = vmatpush3.bf16.msra.mxu0 %v836_v23 }
  0x4f   :  { %769 = vmatpush3.bf16.msra.mxu1 %v837_v24  ;;  %748 = vmatprep.subr.bf16.mxu0 %v838_v25  ;;  %v708_v25 = vld [vmem:[%s1084_s4] ss:$0 sm:$0xff] }
  0x50   :  { %770 = vmatprep.subr.bf16.mxu1 %v839_v26 }
  0x52   :  { %749 = vmatpush3.bf16.msra.mxu0 %v840_v27 }
  0x53   :  { %771 = vmatpush3.bf16.msra.mxu1 %v841_v28  ;;  %750 = vmatprep.subr.bf16.mxu0 %v842_v29 }
  0x54   :  { %772 = vmatprep.subr.bf16.mxu1 %v843_v30 }
  0x56   :  { %751 = vmatpush3.bf16.msra.mxu0 %v844_v31 }
  0x57   :  { %773 = vmatpush3.bf16.msra.mxu1 %v845_v32  ;;  %752 = vmatprep.subr.bf16.mxu0 %v846_v33 }
  0x58   :  { %774 = vmatprep.subr.bf16.mxu1 %v847_v34 }
  0x5a   :  { %753 = vmatpush3.bf16.msra.mxu0 %v848_v35 }
  0x5b   :  { %775 = vmatpush3.bf16.msra.mxu1 %v849_v36  ;;  %754 = vmatprep.subr.bf16.mxu0 %v850_v37 }
  0x5c   :  { %776 = vmatprep.subr.bf16.mxu1 %v851_v38 }
  0x5e   :  { %755 = vmatpush3.bf16.msra.mxu0 %v852_v39 }
  0x5f   :  { %777 = vmatpush3.bf16.msra.mxu1 %v853_v40  ;;  %756 = vmatprep.subr.bf16.mxu0 %v854_v41 }
  0x60   :  { %778 = vmatprep.subr.bf16.mxu1 %v855_v42 }
  0x62   :  { %757 = vmatpush3.bf16.msra.mxu0 %v856_v43  ;;  %v593_v43 = vld [vmem:[%s1085_s5] sm:$0x1]  ;;  %s928_s5 = scalar_lea.vmem %s689_s22, 16 }
  0x63   :  { %779 = vmatpush3.bf16.msra.mxu1 %v857_v44  ;;  %796 = vmatprep.subr.bf16.mxu0 %v966_v20  ;;  %p929_p10 = scmp.ne.s32.totalorder %s689_s22, %s928_s5  ;;  %p934_p12 = scmp.lt.s32.totalorder %s932_s23, %s928_s5 }
  0x65   :  { %p935_p13 = por %p934_p12, %p933_p11 }
  0x67   :  { %p936_p0 = pnand %p935_p13, %p929_p10 }
  0xcc   :  { %v598_v44 = vpop.permute.xlu0 %597 }
  0xcd   :  { %v603_v45 = vrot.slane %v598_v44, %v86_v47 }
 0x118   :  { %v182_v56 = vpop.f32.mrb[0].mxu0 }
 0x119   :  { %v225_v57 = vpop.f32.mrb[0].mxu1  ;;  %v183_v58 = vadd.f32 %v182_v56, %v87_v52  ;;  %v184_v60 = vpop.f32.mrb[1].mxu0 }
 0x11a   :  { %v226_v59 = vadd.f32 %v225_v57, %v95_v53  ;;  %v227_v61 = vpop.f32.mrb[1].mxu1  ;;  %v185_v62 = vadd.f32 %v184_v60, %v91_v54  ;;  %v186_v0 = vpop.f32.mrb[2].mxu0 }
 0x11b   :  { %v228_v63 = vadd.f32 %v227_v61, %v99_v55  ;;  %v229_v1 = vpop.f32.mrb[2].mxu1  ;;  %v187_v3 = vadd.f32 %v186_v0, %v87_v52  ;;  %v188_v5 = vpop.f32.mrb[3].mxu0  ;;  %v234_v10 = vmax.f32 %v183_v58, 0.0 }
 0x11c   :  { %v236_v2 = vmax.f32 %v226_v59, 0.0  ;;  %v230_v4 = vadd.f32 %v229_v1, %v95_v53  ;;  %v231_v6 = vpop.f32.mrb[3].mxu1  ;;  %v189_v8 = vadd.f32 %v188_v5, %v91_v54  ;;  %v235_v13 = vmax.f32 %v185_v62, 0.0 }
 0x11d   :  { %v237_v7 = vmax.f32 %v228_v63, 0.0  ;;  %v232_v9 = vadd.f32 %v231_v6, %v99_v55  ;;  %v238_v11 = vmax.f32 %v187_v3, 0.0 }
 0x11e   :  { %v240_v12 = vmax.f32 %v230_v4, 0.0  ;;  %v239_v14 = vmax.f32 %v189_v8, 0.0 }
 0x11f   :  { %v241_v15 = vmax.f32 %v232_v9, 0.0  ;;  %v242_v16 = vpack.c.bf16 %v238_v11, %v234_v10 }
 0x120   :  { %v244_v17 = vpack.c.bf16 %v240_v12, %v236_v2  ;;  %v243_v18 = vpack.c.bf16 %v239_v14, %v235_v13 }
 0x121   :  { %v245_v19 = vpack.c.bf16 %v241_v15, %v237_v7 }
 0x122   :  { %541 = vmatprep.mubr.bf16.mxu0 %v243_v18 }
 0x123   :  { %582 = vmatprep.mubr.bf16.mxu1 %v245_v19  ;;  %542 = vmatmul.mubr.bf16.vlgmr.msra.gmra.mrb[4].mxu0 %v242_v16 }
 0x124   :  { %583 = vmatmul.mubr.bf16.vlgmr.msra.gmra.mrb[4].mxu1 %v244_v17  ;;  %793 = vmatprep.mubr.msk.f32.mxu0 %vm967_vm1, %v968_v21 }
 0x1f6   :  { %v758_v23 = vpop.f32.mrb[4].mxu0 }
 0x1f7   :  { %v780_v24 = vpop.f32.mrb[4].mxu1  ;;  %v759_v26 = vpop.f32.mrb[5].mxu0 }
 0x1f8   :  { %v781_v27 = vpop.f32.mrb[5].mxu1  ;;  %v760_v28 = vadd.f32 %v759_v26, %v758_v23  ;;  %v761_v30 = vpop.f32.mrb[6].mxu0 }
 0x1f9   :  { %v782_v29 = vadd.f32 %v781_v27, %v780_v24  ;;  %v783_v31 = vpop.f32.mrb[6].mxu1  ;;  %v762_v32 = vpop.f32.mrb[7].mxu0 }
 0x1fa   :  { %v784_v33 = vpop.f32.mrb[7].mxu1  ;;  %v544_v34 = vadd.f32 %v760_v28, %v708_v25  ;;  %v763_v35 = vadd.f32 %v762_v32, %v761_v30 }
 0x1fb   :  { %v785_v36 = vadd.f32 %v784_v33, %v783_v31 }
 0x1fc   :  { %v585_v37 = vadd.f32 %v782_v29, %v544_v34  ;;  %v547_v38 = vadd.f32 %v763_v35, %v708_v25 }
 0x1fe   :  { %v588_v39 = vadd.f32 %v785_v36, %v547_v38  ;;  %v591_v40 = vmax.f32 %v585_v37, 0.0 }
 0x200   :  { %v592_v41 = vmax.f32 %v588_v39, 0.0 }
 0x202   :  { %v797_v42 = vpack.c.bf16 %v592_v41, %v591_v40 }
 0x204   :  { %798 = vmatpush3.bf16.xpose.msra.mxu0 %v797_v42 }
 0x20b   :  { %794 = vmatmul.mubr.f32.vlgmr.msra.gmra.mrb[8].mxu0 %v593_v43 }
 0x2de   :  { %v670_v48 = vpop.f32.mrb[8].mxu0 }
 0x2df   :  { %v671_v49 = vadd.f32 %v670_v48, %v603_v45  ;;  %v795_v50 = vpop.f32.mrb[9].mxu0 }
 0x2e1   :  { %v741_v51 = vmul.f32 -1.442695, %v671_v49 }
 0x2e3   :  { %858 = vpow2.f32 %v741_v51 }
 0x2ed   :  { %v859_v52 = vpop.eup %858 }
 0x2ee   :  { %v677_v53 = vadd.f32 1.0, %v859_v52 }
 0x2f0   :  { %860 = vrcp.f32 %v677_v53 }
 0x2fa   :  { %v861_v54 = vpop.eup %860 }
 0x2fb   :  { %681 = vst.msk [vmem:[#allocation9] sm:$0x1] %vm680_vm2, %v861_v54 }
 0x2fc   :  { %939 = shalt.err (!%p936_p0)
}
 0x2fd   :  { %s940_s1 = scalar_lea.hbm %s1087_s7, 16 }
 0x2fe   :  { %p941_p1 = scmp.ne.s32.totalorder %s1087_s7, %s940_s1  ;;  %p944_p2 = scmp.lt.u32.totalorder %s940_s1, %s1087_s7 }
 0x300   :  { %p946_p3 = pnand %p944_p2, %p941_p1 }
 0x302   :  { %949 = shalt.err (!%p946_p3)
}
 0x303   :  { %691 = dma.vmem_to_hbm [thread:$0]  %s689_s22, 16, %s1087_s7, [#allocation5]  }
 0x304   :  { %954 = dma.done.wait [#allocation5], 16  }
 0x305   :  { %955 = vsyncadd [#allocation5], 4294967280 }
 0x306   :  { %695 = vsyncpa [#allocation4], 1 }
 0x307   :  { %696 = vsyncpa [#allocation7], 1 }
 0x308   :  { %697 = vsyncpa [#allocation5], 1 }

</bundles_post_ra>
